<compile_context>
chip_gen: v6e
topology: v6e:2x2x1
jax: 0.10.0
libtpu: 0.0.40
codegen_flags: <defaults>
</compile_context>

<pallas_src>
import functools

import jax
import jax.numpy as jnp
from jax.experimental import pallas as pl
from jax.experimental.pallas import tpu as pltpu

_LANES = 128


def _loss_kernel(x1_ref, x2_ref, t_ref, out_ref, acc_ref, *,
                 rows_total, block_rows, acc_rows, lanes):
    step = pl.program_id(1)

    # Zero this core's accumulator at the start of its slice.
    @pl.when(step == 0)
    def _():
        acc_ref[...] = jnp.zeros_like(acc_ref)

    x1 = x1_ref[...].astype(jnp.float32)
    x2 = x2_ref[...].astype(jnp.float32)
    t = t_ref[...].astype(jnp.float32)

    # max(-target * exp(input2 - input1), 0)  -- EUP exp + VPU mul/max.
    val = jnp.maximum(-t * jnp.exp(x2 - x1), 0.0)

    # Logical (unclamped) block index -> number of valid rows in this block.
    # Row-based limit keeps all index math comfortably inside int32.
    logical_blk = pl.program_id(0) * pl.num_programs(1) + step
    limit = rows_total - logical_blk * block_rows

    def fold(v):
        # Leading-axis reduction into acc_rows independent vreg rows:
        # pure VPU adds, no XLU, no scalar RMW.
        acc_ref[...] += v.reshape(block_rows // acc_rows, acc_rows,
                                  lanes).sum(axis=0)

    # Fast path: fully valid interior block, no masking work at all.
    @pl.when(limit >= block_rows)
    def _():
        fold(val)

    # Slow path: partial last block, or a clamped/duplicated oversubscribed
    # step (limit <= 0).  Select (NOT multiply-by-mask): rows past the end of
    # the array hold uninitialized VMEM and exp() of that can be Inf/NaN.
    @pl.when(limit < block_rows)
    def _():
        row_ids = jax.lax.broadcasted_iota(jnp.int32, (block_rows, lanes), 0)
        fold(jnp.where(row_ids < limit, val, 0.0))

    # Epilogue: emit this core's partial-sum tile.
    @pl.when(step == pl.num_programs(1) - 1)
    def _():
        out_ref[...] = acc_ref[...]


def margin_ranking_loss_exp(input1, input2, target, *,
                            block_rows=None, num_cores=None, lanes=_LANES):
    """mean(max(-target * exp(input2 - input1), 0)) as a scalar float32.

    Inputs may be any shape/dtype (bf16 welcome -- it halves HBM traffic);
    the kernel upcasts to f32 internally.
    """
    assert input1.shape == input2.shape == target.shape
    n = int(input1.size)
    assert n > 0

    # ---- per-generation defaults -------------------------------------------
    kind = ""
    try:
        kind = jax.devices()[0].device_kind.lower()
    except Exception:  # pragma: no cover - CPU/interpret fallback
        pass
    if num_cores is None:
        # Only v7x has 2 TensorCores per chip; v5e/v6e are single-TC.
        num_cores = 2 if "7" in kind else 1
    if block_rows is None:
        # 8192 rows = 4 MiB/input/step (f32), ~24 MiB live with 3 inputs
        # double-buffered: fits v6e (128 MiB) and v7x (64 MiB) VMEM.
        # v5e stays at 4096 rows (12 MiB).
        block_rows = 4096 if "v5" in kind else 8192

    n_main = (n // lanes) * lanes
    tail = n - n_main

    flats = (jnp.ravel(input1), jnp.ravel(input2), jnp.ravel(target))

    # <128-element ragged tail folded in plain JAX -- no full-array pad/concat.
    tail_sum = jnp.float32(0.0)
    if tail:
        t1, t2, tt = (f[n_main:].astype(jnp.float32) for f in flats)
        tail_sum = jnp.sum(jnp.maximum(-tt * jnp.exp(t2 - t1), 0.0))

    main_sum = jnp.float32(0.0)
    if n_main:
        def as_rows(f):
            # Aligned case: ravel + reshape only (free).  Ragged case: slice
            # the 128-aligned prefix.
            # TODO(synk): XLA may still materialize the prefix slice for
            # ragged inputs; a manual-DMA (pl.ANY) path would avoid even that.
            f = f if n_main == n else f[:n_main]
            return f.reshape(-1, lanes)

        x1, x2, tg = (as_rows(f) for f in flats)
        rows = x1.shape[0]

        br = min(block_rows, ((rows + 7) // 8) * 8)
        acc_rows = 32 if br % 32 == 0 else 8
        num_blocks = pl.cdiv(rows, br)
        if num_blocks < num_cores:
            num_cores = 1  # nothing to split; avoid a fully-masked dup block
        steps_per_core = pl.cdiv(num_blocks, num_cores)
        last_blk = num_blocks - 1

        def in_map(c, i):
            # Clamp oversubscribed steps to a valid block; they are fully
            # masked inside the kernel via the row-limit check.
            return (jnp.minimum(c * steps_per_core + i, last_blk), 0)

        kernel = functools.partial(
            _loss_kernel, rows_total=rows, block_rows=br,
            acc_rows=acc_rows, lanes=lanes)

        core_par = getattr(pltpu, "CORE_PARALLEL", None)
        if num_cores > 1 and core_par is not None:
            semantics = (core_par, getattr(pltpu, "ARBITRARY", "arbitrary"))
        elif num_cores > 1:
            semantics = ("parallel", "arbitrary")
        else:
            semantics = ("arbitrary", "arbitrary")

        # 3 inputs x 2 pipeline buffers x block, plus generous headroom for
        # output/scratch/compiler internals.  Always <= 32 MiB, so it is safe
        # on every generation (v7x physical VMEM is 64 MiB).
        in_bytes = sum(a.dtype.itemsize for a in (x1, x2, tg))
        vmem_limit = int(2 * br * lanes * in_bytes) + (8 << 20)

        partial = pl.pallas_call(
            kernel,
            out_shape=jax.ShapeDtypeStruct((num_cores * acc_rows, lanes),
                                           jnp.float32),
            grid_spec=pltpu.PrefetchScalarGridSpec(
                num_scalar_prefetch=0,
                grid=(num_cores, steps_per_core),
                in_specs=[
                    pl.BlockSpec((br, lanes), in_map),
                    pl.BlockSpec((br, lanes), in_map),
                    pl.BlockSpec((br, lanes), in_map),
                ],
                out_specs=pl.BlockSpec((acc_rows, lanes), lambda c, i: (c, 0)),
                scratch_shapes=[pltpu.VMEM((acc_rows, lanes), jnp.float32)],
            ),
            compiler_params=pltpu.CompilerParams(
                dimension_semantics=semantics,
                vmem_limit_bytes=vmem_limit,
            ),
        )(x1, x2, tg)

        # Tiny combine (num_cores*acc_rows x 128 values) in the wrapper.
        main_sum = jnp.sum(partial)

    return (main_sum + tail_sum) * jnp.float32(1.0 / n)


def _reference(input1, input2, target):
    d = (input2.astype(jnp.float32) - input1.astype(jnp.float32))
    val = jnp.maximum(-target.astype(jnp.float32) * jnp.exp(d), 0.0)
    return jnp.mean(val)


if __name__ == "__main__":
    key = jax.random.PRNGKey(0)
    k1, k2, k3, k4, k5, k6, k7, k8, k9 = jax.random.split(key, 9)

    # Test 1: lane-aligned shape (free ravel+reshape path, single block).
    batch, dim = 16, 128
    i1 = jax.random.normal(k1, (batch, dim), dtype=jnp.float32)
    i2 = jax.random.normal(k2, (batch, dim), dtype=jnp.float32)
    tg = jnp.where(jax.random.bernoulli(k3, 0.5, (batch, dim)), 1.0,
                   -1.0).astype(jnp.float32)
    loss = jax.block_until_ready(margin_ranking_loss_exp(i1, i2, tg))
    ref = _reference(i1, i2, tg)
    assert jnp.allclose(loss, ref, rtol=1e-5, atol=1e-6), (loss, ref)

    # Test 2: ragged shape (exercises aligned-prefix + wrapper tail fold).
    j1 = jax.random.normal(k4, (7, 50), dtype=jnp.float32)
    j2 = jax.random.normal(k5, (7, 50), dtype=jnp.float32)
    jt = jnp.where(jax.random.bernoulli(k6, 0.5, (7, 50)), 1.0,
                   -1.0).astype(jnp.float32)
    loss2 = jax.block_until_ready(margin_ranking_loss_exp(j1, j2, jt))
    ref2 = _reference(j1, j2, jt)
    assert jnp.allclose(loss2, ref2, rtol=1e-5, atol=1e-6), (loss2, ref2)

    # Test 3: small explicit block_rows to exercise multi-step accumulation,
    # the partial-last-block masked path, and (on v7x) the 2-core split.
    m1 = jax.random.normal(k7, (100, 128), dtype=jnp.float32)
    m2 = jax.random.normal(k8, (100, 128), dtype=jnp.float32)
    mt = jnp.where(jax.random.bernoulli(k9, 0.5, (100, 128)), 1.0,
                   -1.0).astype(jnp.float32)
    loss3 = jax.block_until_ready(
        margin_ranking_loss_exp(m1, m2, mt, block_rows=32))
    ref3 = _reference(m1, m2, mt)
    assert jnp.allclose(loss3, ref3, rtol=1e-5, atol=1e-6), (loss3, ref3)

    print("KERNEL_OK")
</pallas_src>

<mosaic_0001>
module attributes {stable_mosaic.version = 11 : i64} {
  func.func @_loss_kernel(%arg0: i32, %arg1: i32, %arg2: memref<16x128xf32, #tpu.memory_space<vmem>>, %arg3: memref<16x128xf32, #tpu.memory_space<vmem>>, %arg4: memref<16x128xf32, #tpu.memory_space<vmem>>, %arg5: memref<8x128xf32, #tpu.memory_space<vmem>>, %arg6: memref<8x128xf32, #tpu.memory_space<vmem>>) attributes {dimension_semantics = [#tpu.dimension_semantics<arbitrary>, #tpu.dimension_semantics<arbitrary>], iteration_bounds = array<i64: 1, 1>, scalar_prefetch = 0 : i64, scratch_operands = 1 : i64, tpu.core_type = #tpu.core_type<tc>, window_params = [{transform_indices = @transform_0, window_bounds = array<i64: 16, 128>}, {transform_indices = @transform_1, window_bounds = array<i64: 16, 128>}, {transform_indices = @transform_2, window_bounds = array<i64: 16, 128>}, {transform_indices = @transform_3, window_bounds = array<i64: 8, 128>}]} {
    %c0_i32 = arith.constant 0 : i32
    %0 = arith.cmpi eq, %arg1, %c0_i32 : i32
    %1 = arith.extui %0 : i1 to i32
    %c0_i32_0 = arith.constant 0 : i32
    %2 = arith.cmpi ne, %1, %c0_i32_0 : i32
    scf.if %2 {
      %cst_14 = arith.constant 0.000000e+00 : f32
      %26 = vector.broadcast %cst_14 : f32 to vector<8x128xf32>
      %c0_15 = arith.constant 0 : index
      %c0_16 = arith.constant 0 : index
      %27 = vector.load %arg6[%c0_15, %c0_16] : memref<8x128xf32, #tpu.memory_space<vmem>>, vector<8x128xf32>
      tpu.vector_store %arg6[%c0_15, %c0_16], %26 {strides = array<i32>} : memref<8x128xf32, #tpu.memory_space<vmem>>, vector<8x128xf32>,
    } else {
    }
    %c0 = arith.constant 0 : index
    %c0_1 = arith.constant 0 : index
    %3 = vector.load %arg2[%c0, %c0_1] : memref<16x128xf32, #tpu.memory_space<vmem>>, vector<16x128xf32>
    %c0_2 = arith.constant 0 : index
    %c0_3 = arith.constant 0 : index
    %4 = vector.load %arg3[%c0_2, %c0_3] : memref<16x128xf32, #tpu.memory_space<vmem>>, vector<16x128xf32>
    %c0_4 = arith.constant 0 : index
    %c0_5 = arith.constant 0 : index
    %5 = vector.load %arg4[%c0_4, %c0_5] : memref<16x128xf32, #tpu.memory_space<vmem>>, vector<16x128xf32>
    %cst = arith.constant 0.000000e+00 : f32
    %6 = vector.broadcast %cst : f32 to vector<16x128xf32>
    %7 = arith.subf %6, %5 : vector<16x128xf32>
    %8 = arith.subf %4, %3 : vector<16x128xf32>
    %9 = math.exp %8 : vector<16x128xf32>
    %10 = arith.mulf %7, %9 : vector<16x128xf32>
    %cst_6 = arith.constant 0.000000e+00 : f32
    %11 = vector.broadcast %cst_6 : f32 to vector<16x128xf32>
    %12 = arith.maximumf %10, %11 : vector<16x128xf32>
    %c1_i32 = arith.constant 1 : i32
    %13 = arith.muli %arg0, %c1_i32 : i32
    %14 = arith.addi %13, %arg1 : i32
    %c16_i32 = arith.constant 16 : i32
    %15 = arith.muli %14, %c16_i32 : i32
    %c16_i32_7 = arith.constant 16 : i32
    %16 = arith.subi %c16_i32_7, %15 : i32
    %c16_i32_8 = arith.constant 16 : i32
    %17 = arith.cmpi sge, %16, %c16_i32_8 : i32
    %18 = arith.extui %17 : i1 to i32
    %c0_i32_9 = arith.constant 0 : i32
    %19 = arith.cmpi ne, %18, %c0_i32_9 : i32
    scf.if %19 {
      %c0_14 = arith.constant 0 : index
      %c0_15 = arith.constant 0 : index
      %26 = vector.load %arg6[%c0_14, %c0_15] : memref<8x128xf32, #tpu.memory_space<vmem>>, vector<8x128xf32>
      %27 = vector.shape_cast %12 : vector<16x128xf32> to vector<2x8x128xf32>
      %cst_16 = arith.constant dense<0.000000e+00> : vector<8x128xf32>
      %28 = vector.multi_reduction <add>, %27, %cst_16 [0] : vector<2x8x128xf32> to vector<8x128xf32>
      %29 = arith.addf %26, %28 : vector<8x128xf32>
      %c0_17 = arith.constant 0 : index
      %c0_18 = arith.constant 0 : index
      %30 = vector.load %arg6[%c0_17, %c0_18] : memref<8x128xf32, #tpu.memory_space<vmem>>, vector<8x128xf32>
      tpu.vector_store %arg6[%c0_17, %c0_18], %29 {strides = array<i32>} : memref<8x128xf32, #tpu.memory_space<vmem>>, vector<8x128xf32>,
    } else {
    }
    %c16_i32_10 = arith.constant 16 : i32
    %20 = arith.cmpi slt, %16, %c16_i32_10 : i32
    %21 = arith.extui %20 : i1 to i32
    %c0_i32_11 = arith.constant 0 : i32
    %22 = arith.cmpi ne, %21, %c0_i32_11 : i32
    scf.if %22 {
      %26 = tpu.iota {dimensions = array<i32: 0>} : vector<16x128xi32>
      %27 = vector.broadcast %16 : i32 to vector<16x128xi32>
      %28 = arith.cmpi slt, %26, %27 : vector<16x128xi32>
      %cst_14 = arith.constant 0.000000e+00 : f32
      %29 = vector.broadcast %cst_14 : f32 to vector<16x128xf32>
      %30 = arith.select %28, %12, %29 : vector<16x128xi1>, vector<16x128xf32>
      %c0_15 = arith.constant 0 : index
      %c0_16 = arith.constant 0 : index
      %31 = vector.load %arg6[%c0_15, %c0_16] : memref<8x128xf32, #tpu.memory_space<vmem>>, vector<8x128xf32>
      %32 = vector.shape_cast %30 : vector<16x128xf32> to vector<2x8x128xf32>
      %cst_17 = arith.constant dense<0.000000e+00> : vector<8x128xf32>
      %33 = vector.multi_reduction <add>, %32, %cst_17 [0] : vector<2x8x128xf32> to vector<8x128xf32>
      %34 = arith.addf %31, %33 : vector<8x128xf32>
      %c0_18 = arith.constant 0 : index
      %c0_19 = arith.constant 0 : index
      %35 = vector.load %arg6[%c0_18, %c0_19] : memref<8x128xf32, #tpu.memory_space<vmem>>, vector<8x128xf32>
      tpu.vector_store %arg6[%c0_18, %c0_19], %34 {strides = array<i32>} : memref<8x128xf32, #tpu.memory_space<vmem>>, vector<8x128xf32>,
    } else {
    }
    %c0_i32_12 = arith.constant 0 : i32
    %23 = arith.cmpi eq, %arg1, %c0_i32_12 : i32
    %24 = arith.extui %23 : i1 to i32
    %c0_i32_13 = arith.constant 0 : i32
    %25 = arith.cmpi ne, %24, %c0_i32_13 : i32
    scf.if %25 {
      %c0_14 = arith.constant 0 : index
      %c0_15 = arith.constant 0 : index
      %26 = vector.load %arg6[%c0_14, %c0_15] : memref<8x128xf32, #tpu.memory_space<vmem>>, vector<8x128xf32>
      %c0_16 = arith.constant 0 : index
      %c0_17 = arith.constant 0 : index
      %27 = vector.load %arg5[%c0_16, %c0_17] : memref<8x128xf32, #tpu.memory_space<vmem>>, vector<8x128xf32>
      tpu.vector_store %arg5[%c0_16, %c0_17], %26 {strides = array<i32>} : memref<8x128xf32, #tpu.memory_space<vmem>>, vector<8x128xf32>,
    } else {
    }
    return
  }
  func.func @transform_0(%arg0: i32, %arg1: i32) -> (i32, i32) {
    %c1_i32 = arith.constant 1 : i32
    %0 = arith.muli %arg0, %c1_i32 : i32
    %1 = arith.addi %0, %arg1 : i32
    %c0_i32 = arith.constant 0 : i32
    %2 = arith.minsi %1, %c0_i32 : i32
    %c0_i32_0 = arith.constant 0 : i32
    %c0_i32_1 = arith.constant 0 : i32
    return %2, %c0_i32_0 : i32, i32
  }
  func.func @transform_1(%arg0: i32, %arg1: i32) -> (i32, i32) {
    %c1_i32 = arith.constant 1 : i32
    %0 = arith.muli %arg0, %c1_i32 : i32
    %1 = arith.addi %0, %arg1 : i32
    %c0_i32 = arith.constant 0 : i32
    %2 = arith.minsi %1, %c0_i32 : i32
    %c0_i32_0 = arith.constant 0 : i32
    %c0_i32_1 = arith.constant 0 : i32
    return %2, %c0_i32_0 : i32, i32
  }
  func.func @transform_2(%arg0: i32, %arg1: i32) -> (i32, i32) {
    %c1_i32 = arith.constant 1 : i32
    %0 = arith.muli %arg0, %c1_i32 : i32
    %1 = arith.addi %0, %arg1 : i32
    %c0_i32 = arith.constant 0 : i32
    %2 = arith.minsi %1, %c0_i32 : i32
    %c0_i32_0 = arith.constant 0 : i32
    %c0_i32_1 = arith.constant 0 : i32
    return %2, %c0_i32_0 : i32, i32
  }
  func.func @transform_3(%arg0: i32, %arg1: i32) -> (i32, i32) {
    %c0_i32 = arith.constant 0 : i32
    %c0_i32_0 = arith.constant 0 : i32
    return %arg0, %c0_i32 : i32, i32
  }
}

</mosaic_0001>

<bundles_post_ra>
// kernel: tpu_custom_call.1
= control target key start
LH: loop header
LB: loop body
LE: loop exit
PB: predicated region body
PF: predicated region fallthrough
CT: control target
= control target key end

     0   :  { %8 = vsyncpa [#allocation4], 0  ;;  %s297_s0 = inlined_call_operand.hbm [shape: f32[16,128], index: 0, kind: input, shape index: {}]   ;;  %s298_s1 = inlined_call_operand.hbm [shape: f32[16,128], index: 1, kind: input, shape index: {}]   ;;  %s299_s2 = inlined_call_operand.hbm [shape: f32[16,128], index: 2, kind: input, shape index: {}]   ;;  %s300_s3 = inlined_call_operand.hbm [shape: f32[8,128], index: 3, kind: output, shape index: {}]  }
   0x1   :  { %9 = vsyncpa [#allocation7], 0 }
   0x2   :  { %10 = vsyncpa [#allocation5], 0  ;;  %s259_s12 = smov [#allocation6]   ;;  %s260_s14 = smov [#allocation3]  }
   0x3   :  { %s40_s13 = sshll.u32 %s259_s12, 4  ;;  %s22_s15 = sshll.u32 %s260_s14, 4  ;;  %s41_s13 = int_to_ptr.vmem [resolvable:$true] %s40_s13  ;;  %s23_s15 = int_to_ptr.vmem [resolvable:$true] %s22_s15 }
   0x4   :  { %s181_s16 = scalar_lea.vmem %s41_s13, 256  ;;  %p186_p1 = scmp.lt.s32.totalorder %s41_s13, %s41_s13 }
   0x5   :  { %p182_p0 = scmp.ne.s32.totalorder %s41_s13, %s181_s16  ;;  %p187_p2 = scmp.lt.s32.totalorder %s181_s16, %s181_s16 }
   0x7   :  { %p188_p3 = por %p187_p2, %p186_p1 }
   0x9   :  { %p189_p4 = pnand %p188_p3, %p182_p0 }
   0xb   :  { %192 = shalt.err (!%p189_p4)
}
   0xc   :  { %s261_s17 = smov 128   ;;  %s262_s18 = smov 8  }
   0xd   :  { %46 = dma.hbm_to_vmem [thread:$0]  %s298_s1, 256, %s41_s13, [#allocation7], %s261_s17, %s261_s17, %s262_s18  }
   0xe   :  { %s201_s21 = scalar_lea.vmem %s23_s15, 256  ;;  %p206_p6 = scmp.lt.s32.totalorder %s23_s15, %s23_s15 }
   0xf   :  { %p202_p5 = scmp.ne.s32.totalorder %s23_s15, %s201_s21  ;;  %p207_p7 = scmp.lt.s32.totalorder %s201_s21, %s201_s21 }
  0x11   :  { %p208_p8 = por %p207_p7, %p206_p6 }
  0x13   :  { %p209_p9 = pnand %p208_p8, %p202_p5 }
  0x15   :  { %212 = shalt.err (!%p209_p9)
}
  0x16   :  { %28 = dma.hbm_to_vmem [thread:$0]  %s297_s0, 256, %s23_s15, [#allocation4], %s261_s17, %s261_s17, %s262_s18  }
  0x17   :  { %s263_s24 = smov [#allocation8]  }
  0x18   :  { %s58_s25 = sshll.u32 %s263_s24, 4  ;;  %s59_s25 = int_to_ptr.vmem [resolvable:$true] %s58_s25 }
  0x19   :  { %s221_s26 = scalar_lea.vmem %s59_s25, 256  ;;  %p226_p11 = scmp.lt.s32.totalorder %s59_s25, %s59_s25 }
  0x1a   :  { %p222_p10 = scmp.ne.s32.totalorder %s59_s25, %s221_s26  ;;  %p227_p12 = scmp.lt.s32.totalorder %s221_s26, %s221_s26 }
  0x1c   :  { %p228_p13 = por %p227_p12, %p226_p11 }
  0x1e   :  { %p229_p0 = pnand %p228_p13, %p222_p10 }
  0x20   :  { %232 = shalt.err (!%p229_p0)
}
  0x21   :  { %64 = dma.hbm_to_vmem [thread:$0]  %s299_s2, 256, %s59_s25, [#allocation7], %s261_s17, %s261_s17, %s262_s18  }
  0x22   :  { %253 = dma.done.wait [#allocation4], 256  }
  0x23   :  { %254 = vsyncadd [#allocation4], 4294967040 }
  0x24   :  { %255 = dma.done.wait [#allocation7], 512  }
  0x25   :  { %256 = vsyncadd [#allocation7], 4294966784  ;;  %v91_v0 = vld [vmem:[#allocation3] sm:$0xff]  ;;  %v92_v1 = vld [vmem:[#allocation3 + $0x8] sm:$0xff]  ;;  %s264_s0 = smov [#allocation9]  }
  0x26   :  { %v93_v2 = vld [vmem:[#allocation6] sm:$0xff]  ;;  %v94_v3 = vld [vmem:[#allocation6 + $0x8] sm:$0xff]  ;;  %v95_v8 = vld [vmem:[#allocation8] sm:$0xff]  ;;  %s147_s2 = sshll.u32 %s264_s0, 4  ;;  %s148_s2 = int_to_ptr.vmem [resolvable:$true] %s147_s2 }
  0x27   :  { %v99_v4 = vsub.f32 %v93_v2, %v91_v0  ;;  %v100_v5 = vsub.f32 %v94_v3, %v92_v1  ;;  %v96_v9 = vld [vmem:[#allocation8 + $0x8] sm:$0xff]  ;;  %v97_v10 = vsub.f32 0.0, %v95_v8  ;;  %s233_s28 = scalar_lea.vmem %s148_s2, 128  ;;  %p238_p2 = scmp.lt.s32.totalorder %s148_s2, %s148_s2 }
  0x28   :  { %v98_v11 = vsub.f32 0.0, %v96_v9  ;;  %p234_p1 = scmp.ne.s32.totalorder %s148_s2, %s233_s28  ;;  %p239_p3 = scmp.lt.s32.totalorder %s233_s28, %s233_s28 }
  0x29   :  { %v101_v6 = vmul.f32 1.442695, %v99_v4  ;;  %v103_v7 = vmul.f32 1.442695, %v100_v5 }
  0x2a   :  { %p240_p4 = por %p239_p3, %p238_p2 }
  0x2b   :  { %169 = vpow2.f32 %v101_v6 }
  0x2c   :  { %171 = vpow2.f32 %v103_v7  ;;  %p241_p5 = pnand %p240_p4, %p234_p1 }
  0x38   :  { %v170_v12 = vpop.eup %169 }
  0x39   :  { %v172_v13 = vpop.eup %171  ;;  %v105_v14 = vmul.f32 %v170_v12, %v97_v10 }
  0x3a   :  { %v106_v15 = vmul.f32 %v172_v13, %v98_v11 }
  0x3b   :  { %v107_v16 = vmax.f32 %v105_v14, 0.0 }
  0x3c   :  { %v108_v17 = vmax.f32 %v106_v15, 0.0 }
  0x3e   :  { %v117_v18 = vadd.f32 %v108_v17, %v107_v16 }
  0x40   :  { %140 = vst [vmem:[#allocation9] sm:$0xff] %v117_v18 }
  0x41   :  { %244 = shalt.err (!%p241_p5)
}
  0x42   :  { %150 = dma.vmem_to_hbm [thread:$0]  %s148_s2, 128, %s300_s3, [#allocation5]  }
  0x43   :  { %257 = dma.done.wait [#allocation5], 128  }
  0x44   :  { %258 = vsyncadd [#allocation5], 4294967168 }
  0x45   :  { %154 = vsyncpa [#allocation4], 1 }
  0x46   :  { %155 = vsyncpa [#allocation7], 1 }
  0x47   :  { %156 = vsyncpa [#allocation5], 1 }

</bundles_post_ra>
